<compile_context>
chip_gen: v7x
topology: tpu7x:2x2x1
jax: 0.10.0
libtpu: 0.0.40
codegen_flags: <defaults>
</compile_context>

<pallas_src>
import math
from functools import partial

import jax
import jax.numpy as jnp
from jax.experimental import pallas as pl
from jax.experimental.pallas import tpu as pltpu


def _round_up(n, m):
    return ((n + m - 1) // m) * m


# Tile caps.  With bf16 inputs / f32 output the worst case double-buffered
# footprint is 2*(tm*tk + tk*tn)*2B + 2*tm*tn*4B = 2 + 2 + 2 MiB ~= 6 MiB,
# safe for every generation (v5e/v6e 128 MiB VMEM, v7x 64 MiB physical).
_TM_CAP = 512
_TN_CAP = 512
_TK_CAP = 1024


def _weight_tiles(n_in, n_out):
    tk = min(_round_up(n_in, 128), _TK_CAP)
    tn = min(_round_up(n_out, 128), _TN_CAP)
    return tk, tn


def prepare_linear_params(w, b):
    """One-time prep: (out,in) f32 weight -> padded (in,out) bf16, (1,out) f32 bias."""
    n_out, n_in = w.shape
    tk, tn = _weight_tiles(n_in, n_out)
    fp = _round_up(n_in, tk)
    hp = _round_up(n_out, tn)
    wp = jnp.pad(w.T, ((0, fp - n_in), (0, hp - n_out))).astype(jnp.bfloat16)
    bp = jnp.pad(b, (0, hp - n_out)).astype(jnp.float32).reshape(1, hp)
    return wp, bp, n_out


def _linear_kernel(x_ref, w_ref, b_ref, o_ref, *, apply_relu):
    # x_ref: (tm, tk) bf16 | w_ref: (tk, tn) bf16 | b_ref: (1, tn) f32
    # o_ref: (tm, tn) f32 -- doubles as the K-axis accumulator (resident across k).
    k = pl.program_id(2)

    @pl.when(k == 0)
    def _():
        o_ref[...] = jnp.zeros_like(o_ref)

    o_ref[...] += jnp.dot(
        x_ref[...], w_ref[...], preferred_element_type=jnp.float32
    )

    @pl.when(k == pl.num_programs(2) - 1)
    def _():
        out = o_ref[...] + b_ref[...]  # bias add only in the epilogue
        if apply_relu:
            out = jnp.maximum(out, 0.0)
        o_ref[...] = out


def _dimension_semantics(grid):
    # Only CORE_PARALLEL actually shards a grid axis across v7x's two
    # TensorCores; plain "parallel" does not change codegen.  Use it only on a
    # v7x device and only when the sharded axis really has >= 2 blocks (the
    # tiny demo shapes collapse to a (1,1,1) grid and take the plain path).
    try:
        kind = jax.devices()[0].device_kind.lower()
    except Exception:  # pragma: no cover - defensive
        kind = ""
    if "v7" in kind:
        if grid[1] >= 2:
            return (pltpu.PARALLEL, pltpu.CORE_PARALLEL, pltpu.ARBITRARY)
        if grid[0] >= 2:
            return (pltpu.CORE_PARALLEL, pltpu.PARALLEL, pltpu.ARBITRARY)
    return (pltpu.PARALLEL, pltpu.PARALLEL, pltpu.ARBITRARY)


@partial(jax.jit, static_argnames=("out_features", "apply_relu"))
def linear_layer_pallas(x, wp, bp, out_features, apply_relu):
    """y = [relu](x @ W + b) with W pre-transposed/padded/bf16 in (in, out) layout."""
    B, F = x.shape
    Fp, Hp = wp.shape
    assert F <= Fp and out_features <= Hp

    tm = min(_round_up(B, 16), _TM_CAP)  # 16-row alignment for bf16 sublane packing
    Bp = _round_up(B, tm)
    tn = min(Hp, _TN_CAP)                # Hp was padded to a multiple of tn at init
    tk = min(Fp, _TK_CAP)                # Fp was padded to a multiple of tk at init

    if (Bp, Fp) != (B, F):
        x = jnp.pad(x, ((0, Bp - B), (0, Fp - F)))
    x = x.astype(jnp.bfloat16)

    grid = (Bp // tm, Hp // tn, Fp // tk)

    out = pl.pallas_call(
        partial(_linear_kernel, apply_relu=apply_relu),
        out_shape=jax.ShapeDtypeStruct((Bp, Hp), jnp.float32),
        grid_spec=pltpu.PrefetchScalarGridSpec(
            num_scalar_prefetch=0,
            grid=grid,
            in_specs=[
                pl.BlockSpec((tm, tk), lambda i, j, k: (i, k)),   # x tile
                pl.BlockSpec((tk, tn), lambda i, j, k: (k, j)),   # W tile (in, out)
                pl.BlockSpec((1, tn), lambda i, j, k: (0, j)),    # bias tile
            ],
            out_specs=pl.BlockSpec((tm, tn), lambda i, j, k: (i, j)),
        ),
        compiler_params=pltpu.CompilerParams(
            dimension_semantics=_dimension_semantics(grid),
            vmem_limit_bytes=32 * 1024 * 1024,
        ),
    )(x, wp, bp)

    return out[:B, :out_features]


class MLP:
    """JAX/Pallas port of the reference PyTorch MLP (including its early-return quirk)."""

    def __init__(self, n_features, hidden_layer_sizes, n_targets, key):
        layer_sizes = (n_features,) + tuple(hidden_layer_sizes) + (n_targets,)
        self.params = []     # raw f32 params in the PyTorch (out, in) layout
        self.prepared = []   # (padded/transposed bf16 W, padded f32 bias, out_features)
        for i in range(len(layer_sizes) - 1):
            fan_in = layer_sizes[i]
            fan_out = layer_sizes[i + 1]
            key, wk, bk = jax.random.split(key, 3)
            # PyTorch nn.Linear default init: U(-1/sqrt(fan_in), 1/sqrt(fan_in))
            bound = 1.0 / math.sqrt(fan_in)
            w = jax.random.uniform(
                wk, (fan_out, fan_in), jnp.float32, minval=-bound, maxval=bound
            )
            b = jax.random.uniform(
                bk, (fan_out,), jnp.float32, minval=-bound, maxval=bound
            )
            self.params.append((w, b))
            self.prepared.append(prepare_linear_params(w, b))

    def forward(self, x):
        n_layers = len(self.prepared)
        for i, (wp, bp, h) in enumerate(self.prepared):
            x = linear_layer_pallas(
                x, wp, bp, out_features=h, apply_relu=i < n_layers - 1
            )
            return x  # matches the reference: returns after the FIRST layer


if __name__ == "__main__":
    key = jax.random.PRNGKey(0)
    key, xk, mk = jax.random.split(key, 3)

    # Small shapes consistent with the module: batch=8, n_features=32,
    # hidden_layer_sizes=(64, 32), n_targets=10.
    batch = 8
    n_features = 32
    hidden_layer_sizes = (64, 32)
    n_targets = 10

    x = jax.random.normal(xk, (batch, n_features), jnp.float32)
    model = MLP(n_features, hidden_layer_sizes, n_targets, mk)

    out = model.forward(x)
    out = jax.block_until_ready(out)

    # Reference check (forward returns relu(linear0(x)) due to the early return).
    # The kernel uses bf16 operands with f32 accumulation, so compare against a
    # bf16-operand reference (and use tolerances compatible with bf16 inputs).
    w0, b0 = model.params[0]
    ref = jnp.maximum(
        jnp.dot(
            x.astype(jnp.bfloat16),
            w0.astype(jnp.bfloat16).T,
            preferred_element_type=jnp.float32,
        )
        + b0,
        0.0,
    )
    assert out.shape == (batch, hidden_layer_sizes[0])
    assert jnp.allclose(out, ref, atol=1e-2, rtol=1e-2)

    print("KERNEL_OK")
</pallas_src>

<mosaic_0001>
module attributes {stable_mosaic.version = 11 : i64} {
  func.func @_linear_kernel(%arg0: i32, %arg1: i32, %arg2: i32, %arg3: memref<16x128xbf16, #tpu.memory_space<vmem>>, %arg4: memref<128x128xbf16, #tpu.memory_space<vmem>>, %arg5: memref<1x128xf32, #tpu.memory_space<vmem>>, %arg6: memref<16x128xf32, #tpu.memory_space<vmem>>) attributes {dimension_semantics = [#tpu.dimension_semantics<parallel>, #tpu.dimension_semantics<parallel>, #tpu.dimension_semantics<arbitrary>], iteration_bounds = array<i64: 1, 1, 1>, scalar_prefetch = 0 : i64, scratch_operands = 0 : i64, tpu.core_type = #tpu.core_type<tc>, window_params = [{transform_indices = @transform_0, window_bounds = array<i64: 16, 128>}, {transform_indices = @transform_1, window_bounds = array<i64: 128, 128>}, {transform_indices = @transform_2, window_bounds = array<i64: 1, 128>}, {transform_indices = @transform_3, window_bounds = array<i64: 16, 128>}]} {
    %c0_i32 = arith.constant 0 : i32
    %0 = arith.cmpi eq, %arg2, %c0_i32 : i32
    %1 = arith.extui %0 : i1 to i32
    %c0_i32_0 = arith.constant 0 : i32
    %2 = arith.cmpi ne, %1, %c0_i32_0 : i32
    scf.if %2 {
      %cst_10 = arith.constant 0.000000e+00 : f32
      %12 = vector.broadcast %cst_10 : f32 to vector<16x128xf32>
      %c0_11 = arith.constant 0 : index
      %c0_12 = arith.constant 0 : index
      %13 = vector.load %arg6[%c0_11, %c0_12] : memref<16x128xf32, #tpu.memory_space<vmem>>, vector<16x128xf32>
      tpu.vector_store %arg6[%c0_11, %c0_12], %12 {strides = array<i32>} : memref<16x128xf32, #tpu.memory_space<vmem>>, vector<16x128xf32>,
    } else {
    }
    %c0 = arith.constant 0 : index
    %c0_1 = arith.constant 0 : index
    %3 = vector.load %arg6[%c0, %c0_1] : memref<16x128xf32, #tpu.memory_space<vmem>>, vector<16x128xf32>
    %c0_2 = arith.constant 0 : index
    %c0_3 = arith.constant 0 : index
    %4 = vector.load %arg3[%c0_2, %c0_3] : memref<16x128xbf16, #tpu.memory_space<vmem>>, vector<16x128xbf16>
    %c0_4 = arith.constant 0 : index
    %c0_5 = arith.constant 0 : index
    %5 = vector.load %arg4[%c0_4, %c0_5] : memref<128x128xbf16, #tpu.memory_space<vmem>>, vector<128x128xbf16>
    %cst = arith.constant dense<0.000000e+00> : vector<16x128xf32>
    %6 = tpu.matmul %4, %5, %cst {dimension_numbers = #tpu.dot_dimension_numbers<[1], [0], [0], [1], [0, 0, 1, 1], [], []>} : vector<16x128xbf16>, vector<128x128xbf16>, vector<16x128xf32> -> vector<16x128xf32>
    %7 = arith.addf %3, %6 : vector<16x128xf32>
    %c0_6 = arith.constant 0 : index
    %c0_7 = arith.constant 0 : index
    %8 = vector.load %arg6[%c0_6, %c0_7] : memref<16x128xf32, #tpu.memory_space<vmem>>, vector<16x128xf32>
    tpu.vector_store %arg6[%c0_6, %c0_7], %7 {strides = array<i32>} : memref<16x128xf32, #tpu.memory_space<vmem>>, vector<16x128xf32>,
    %c0_i32_8 = arith.constant 0 : i32
    %9 = arith.cmpi eq, %arg2, %c0_i32_8 : i32
    %10 = arith.extui %9 : i1 to i32
    %c0_i32_9 = arith.constant 0 : i32
    %11 = arith.cmpi ne, %10, %c0_i32_9 : i32
    scf.if %11 {
      %c0_10 = arith.constant 0 : index
      %c0_11 = arith.constant 0 : index
      %12 = vector.load %arg6[%c0_10, %c0_11] : memref<16x128xf32, #tpu.memory_space<vmem>>, vector<16x128xf32>
      %c0_12 = arith.constant 0 : index
      %c0_13 = arith.constant 0 : index
      %13 = vector.load %arg5[%c0_12, %c0_13] : memref<1x128xf32, #tpu.memory_space<vmem>>, vector<1x128xf32>
      %14 = vector.broadcast %13 : vector<1x128xf32> to vector<16x128xf32>
      %15 = arith.addf %12, %14 : vector<16x128xf32>
      %cst_14 = arith.constant 0.000000e+00 : f32
      %16 = vector.broadcast %cst_14 : f32 to vector<16x128xf32>
      %17 = arith.maximumf %15, %16 : vector<16x128xf32>
      %c0_15 = arith.constant 0 : index
      %c0_16 = arith.constant 0 : index
      %18 = vector.load %arg6[%c0_15, %c0_16] : memref<16x128xf32, #tpu.memory_space<vmem>>, vector<16x128xf32>
      tpu.vector_store %arg6[%c0_15, %c0_16], %17 {strides = array<i32>} : memref<16x128xf32, #tpu.memory_space<vmem>>, vector<16x128xf32>,
    } else {
    }
    return
  }
  func.func @transform_0(%arg0: i32, %arg1: i32, %arg2: i32) -> (i32, i32) {
    %c0_i32 = arith.constant 0 : i32
    return %arg0, %arg2 : i32, i32
  }
  func.func @transform_1(%arg0: i32, %arg1: i32, %arg2: i32) -> (i32, i32) {
    %c0_i32 = arith.constant 0 : i32
    return %arg2, %arg1 : i32, i32
  }
  func.func @transform_2(%arg0: i32, %arg1: i32, %arg2: i32) -> (i32, i32) {
    %c0_i32 = arith.constant 0 : i32
    %c0_i32_0 = arith.constant 0 : i32
    return %c0_i32, %arg1 : i32, i32
  }
  func.func @transform_3(%arg0: i32, %arg1: i32, %arg2: i32) -> (i32, i32) {
    %c0_i32 = arith.constant 0 : i32
    return %arg0, %arg1 : i32, i32
  }
}

</mosaic_0001>

<bundles_post_ra>
// kernel: linear_layer_pallas.1
= control target key start
LH: loop header
LB: loop body
LE: loop exit
PB: predicated region body
PF: predicated region fallthrough
CT: control target
= control target key end

     0   :  { %8 = vsyncpa [#allocation3], 0  ;;  %s254_s12 = smov [#allocation2]   ;;  %s303_s0 = inlined_call_operand.vmem [shape: bf16[16,128], index: 0, kind: input, shape index: {}]   ;;  %s304_s1 = inlined_call_operand.hbm [shape: bf16[128,128], index: 1, kind: input, shape index: {}]   ;;  %s305_s2 = inlined_call_operand.vmem [shape: f32[1,128], index: 2, kind: input, shape index: {}]   ;;  %s306_s3 = inlined_call_operand.vmem [shape: f32[16,128], index: 3, kind: output, shape index: {}]  }
   0x1   :  { %s16_s13 = sshll.u32 %s254_s12, 4  ;;  %s230_s16 = scalar_lea.hbm %s304_s1, 1024  ;;  %s17_s13 = int_to_ptr.vmem [resolvable:$true] %s16_s13 }
   0x2   :  { %p231_p0 = scmp.ne.s32.totalorder %s304_s1, %s230_s16  ;;  %p234_p1 = scmp.lt.u32.totalorder %s230_s16, %s304_s1 }
   0x4   :  { %p236_p2 = pnand %p234_p1, %p231_p0 }
   0x6   :  { %239 = shalt.err (!%p236_p2)
}
   0x7   :  { %s240_s21 = scalar_lea.vmem %s17_s13, 1024  ;;  %p245_p4 = scmp.lt.s32.totalorder %s17_s13, %s17_s13 }
   0x8   :  { %p241_p3 = scmp.ne.s32.totalorder %s17_s13, %s240_s21  ;;  %p246_p5 = scmp.lt.s32.totalorder %s240_s21, %s240_s21 }
   0xa   :  { %p247_p6 = por %p246_p5, %p245_p4 }
   0xc   :  { %p248_p7 = pnand %p247_p6, %p241_p3 }
   0xe   :  { %251 = shalt.err (!%p248_p7)
}
   0xf   :  { %s255_s22 = smov 64   ;;  %s256_s23 = smov 4  }
  0x10   :  { %22 = dma.hbm_to_vmem [thread:$0]  %s304_s1, 1024, %s17_s13, [#allocation3], %s255_s22, %s255_s22, %s256_s23  }
  0x11   :  { %252 = dma.done.wait [#allocation3], 1024  }
  0x12   :  { %253 = vsyncadd [#allocation3], 4294966272  ;;  %v257_v0 = vmov 0.0   ;;  %vm258_vm0 = vmmov 0   ;;  %v221_v1 = vld [vmem:[#allocation2] sm:$0xff]   ;;  %v222_v2 = vld [vmem:[#allocation2 + $0x8] sm:$0xff]  }
  0x13   :  { %196 = vmatprep.subr.bf16.mxu0 %v257_v0  ;;  %212 = vmatprep.mubr.msk.bf16.mxu0 %vm258_vm0, %v257_v0  ;;  %v223_v3 = vld [vmem:[#allocation2 + $0x10] sm:$0xff]   ;;  %v224_v4 = vld [vmem:[#allocation2 + $0x18] sm:$0xff]   ;;  %v225_v5 = vld [vmem:[#allocation2 + $0x20] sm:$0xff]  }
  0x14   :  { %197 = vmatpush3.bf16.msra.mxu0 %v221_v1  ;;  %v226_v6 = vld [vmem:[#allocation2 + $0x28] sm:$0xff]   ;;  %v227_v7 = vld [vmem:[#allocation2 + $0x30] sm:$0xff]   ;;  %v228_v8 = vld [vmem:[#allocation2 + $0x38] sm:$0xff]  }
  0x15   :  { %198 = vmatprep.subr.bf16.mxu0 %v257_v0  ;;  %v229_v9 = vld [vmem:[%s303_s0] sm:$0xff]  }
  0x16   :  { %v186_v11 = vld [vmem:[%s305_s2] ss:$0 sm:$0xff] }
  0x18   :  { %199 = vmatpush3.bf16.msra.mxu0 %v222_v2 }
  0x19   :  { %200 = vmatprep.subr.bf16.mxu0 %v257_v0 }
  0x1c   :  { %201 = vmatpush3.bf16.msra.mxu0 %v223_v3 }
  0x1d   :  { %202 = vmatprep.subr.bf16.mxu0 %v257_v0 }
  0x20   :  { %203 = vmatpush3.bf16.msra.mxu0 %v224_v4 }
  0x21   :  { %204 = vmatprep.subr.bf16.mxu0 %v257_v0 }
  0x24   :  { %205 = vmatpush3.bf16.msra.mxu0 %v225_v5 }
  0x25   :  { %206 = vmatprep.subr.bf16.mxu0 %v257_v0 }
  0x28   :  { %207 = vmatpush3.bf16.msra.mxu0 %v226_v6 }
  0x29   :  { %208 = vmatprep.subr.bf16.mxu0 %v257_v0 }
  0x2c   :  { %209 = vmatpush3.bf16.msra.mxu0 %v227_v7 }
  0x2d   :  { %210 = vmatprep.subr.bf16.mxu0 %v257_v0 }
  0x30   :  { %211 = vmatpush3.bf16.msra.mxu0 %v228_v8 }
  0x33   :  { %213 = vmatmul.mubr.bf16.vlgmr.msra.gmra.mrb[0].mxu0 %v229_v9 }
 0x106   :  { %v143_v10 = vpop.f32.mrb[0].mxu0 }
 0x107   :  { %v214_v12 = vpop.f32.mrb[1].mxu0  ;;  %v166_v14 = vadd.f32 %v186_v11, %v143_v10 }
 0x108   :  { %v146_v13 = vpop.f32.mrb[2].mxu0 }
 0x109   :  { %v215_v15 = vpop.f32.mrb[3].mxu0  ;;  %v168_v16 = vmax.f32 %v166_v14, 0.0  ;;  %v167_v17 = vadd.f32 %v186_v11, %v146_v13 }
 0x10b   :  { %170 = vst [vmem:[%s306_s3] sm:$0xff] %v168_v16  ;;  %v169_v18 = vmax.f32 %v167_v17, 0.0 }
 0x10d   :  { %171 = vst [vmem:[%s306_s3 + $0x8] sm:$0xff] %v169_v18 }
 0x10e   :  { %176 = vsyncpa [#allocation3], 1 }

</bundles_post_ra>
